<compile_context>
chip_gen: v7x
topology: tpu7x:2x2x1
jax: 0.10.0
libtpu: 0.0.40
codegen_flags: <defaults>
</compile_context>

<pallas_src>
import jax
import jax.numpy as jnp
from jax import lax
from jax.experimental import pallas as pl
from jax.experimental.pallas import tpu as pltpu


def _round_up(n, m):
    return ((n + m - 1) // m) * m


def _vmem_capacity_bytes():
    """Physical VMEM per TensorCore (128 MiB v5e/v6e, 64 MiB v7x)."""
    cap = 128 * 1024 * 1024
    try:  # trace-time HW query; fall back to a safe default if unavailable
        cap = int(getattr(pltpu.get_tpu_info(), "vmem_capacity_bytes", cap))
    except Exception:
        pass
    return cap


def _usable_vmem_bytes():
    cap = _vmem_capacity_bytes()
    # leave headroom for compiler-internal scratch / spill
    return max(min(cap - (16 << 20), (cap * 3) // 4), 24 << 20)


def _invariant_spec(shape, *, single_buffer):
    """BlockSpec for a grid-invariant input (same block every grid step)."""
    index_map = lambda i, *_: (0,) * len(shape)
    if single_buffer:
        # Invariant block -> one VMEM copy instead of the default double buffer.
        return pl.BlockSpec(shape, index_map, pipeline_mode=pl.Buffered(1))
    return pl.BlockSpec(shape, index_map)


# --------------------------------------------------------------------------
# Kernels
# --------------------------------------------------------------------------
def _one_hot_gather_kernel(idx_ref, iota_ref, table_ref, out_ref):
    """out[r, :] = table[idx[r], :] via a one-hot matmul on the MXU.

    idx_ref   : VMEM (block_n, 1) int32  per-tile token ids
    iota_ref  : VMEM (1, V_pad)  int32   hoisted column ids (grid-invariant)
    table_ref : VMEM (V_pad, D)          zero-padded table (grid-invariant)
    out_ref   : VMEM (block_n, D)
    """
    one_hot = (idx_ref[...] == iota_ref[...]).astype(table_ref.dtype)  # (bn, V_pad)
    out_ref[...] = jnp.dot(
        one_hot, table_ref[...], preferred_element_type=jnp.float32
    ).astype(out_ref.dtype)


def _row_gather_kernel(idx_ref, table_ref, out_ref):
    """out[r, :] = table[idx[base + r], :] via dynamic-slice row copies.

    idx_ref   : SMEM (n_pad,) int32  scalar-prefetched token ids (whole array)
    table_ref : VMEM (V, D)          resident table (grid-invariant)
    out_ref   : VMEM (block_n, D)
    """
    block_n = out_ref.shape[0]
    base = pl.program_id(0) * block_n

    def body(r, carry):
        tok = idx_ref[base + r]
        out_ref[pl.ds(r, 1), :] = table_ref[pl.ds(tok, 1), :]
        return carry

    lax.fori_loop(0, block_n, body, 0)


# --------------------------------------------------------------------------
# Wrapper
# --------------------------------------------------------------------------
def skipgram_forward(x, embedding_table, *, block_n=None, use_one_hot=None):
    """SkipGram.forward: out = embeddings(x).

    x               : (B, L) integer token ids
    embedding_table : (V, D)
    returns         : (B, L, D) in embedding_table's dtype
    """
    B, L = x.shape
    V, D = embedding_table.shape
    N = B * L
    esize = jnp.dtype(embedding_table.dtype).itemsize

    # Clamp untrusted indices: dynamic VMEM reads have no runtime bounds check.
    # TODO(synk): nn.Embedding errors on out-of-range ids; we clamp instead.
    idx = jnp.clip(x.reshape(N).astype(jnp.int32), 0, V - 1)

    usable = _usable_vmem_bytes()

    # Dispatch: one-hot MXU gather only pays off for tiny vocabularies.
    # Compute-vs-memory crossover is a few hundred rows in f32 (MXU f32 is
    # multi-pass bf16 emulation), ~1k in bf16; beyond that the row gather
    # stays on the memory roofline instead of scaling O(N*V*D).
    one_hot_max_v = 512 if esize >= 4 else 1024
    v_pad = _round_up(V, 256)  # align contraction dim to the MXU (128/256)
    if use_one_hot is None:
        use_one_hot = v_pad <= one_hot_max_v

    if use_one_hot:
        table = embedding_table
        if v_pad != V:  # padded one-hot columns are always zero -> result unchanged
            table = jnp.pad(embedding_table, ((0, v_pad - V), (0, 0)))
        table_bytes = v_pad * D * esize
        # per-row VMEM: double-buffered out row + one-hot row + lane-padded idx
        per_row = 2 * D * esize + v_pad * 4 + 2 * 128 * 4
        reserved = 2 * table_bytes + 2 * 8 * v_pad * 4 + (4 << 20)
    else:
        table = embedding_table
        table_bytes = V * D * esize
        per_row = 2 * D * esize
        reserved = 2 * table_bytes + (4 << 20)
        if reserved + 8 * per_row > usable:
            # TODO(synk): stream rows from HBM (pl.ANY table + per-row DMA via a
            # pl.Element(1) BlockSpec or manual double-buffered async copies)
            # once the table no longer fits in VMEM.
            raise NotImplementedError(
                "embedding table too large for VMEM-resident gather "
                f"({table_bytes >> 20} MiB, usable {usable >> 20} MiB)")

    if block_n is None:
        # Large tiles: at D=128 the kernel is per-grid-step-overhead bound,
        # not bandwidth bound -> go as big as the VMEM budget allows.
        avail = max(usable - reserved, 1 << 20)
        max_rows = max(8, avail // max(per_row, 1))
        block_n = min(2048, max_rows, _round_up(N, 8))
        # multiple of 128 for the MXU M-dim / dense writeback when possible
        block_n = (block_n // 128) * 128 if block_n >= 128 else _round_up(block_n, 8)
    block_n = max(8, (block_n // 8) * 8)

    n_pad = _round_up(N, block_n)
    if n_pad != N:
        idx = jnp.pad(idx, (0, n_pad - N))  # pad rows gather row 0, sliced off below
    grid = (n_pad // block_n,)

    need = reserved + per_row * block_n
    vmem_limit = int(min(usable, max(32 << 20, need)))

    out_spec = pl.BlockSpec((block_n, D), lambda i, *_: (i, 0))
    out_shape = jax.ShapeDtypeStruct((n_pad, D), embedding_table.dtype)
    compiler_params = pltpu.CompilerParams(
        dimension_semantics=("parallel",),  # independent output row tiles
        vmem_limit_bytes=vmem_limit,
    )

    def run(single_buffer):
        if use_one_hot:
            iota_row = lax.broadcasted_iota(jnp.int32, (1, v_pad), 1)
            call = pl.pallas_call(
                _one_hot_gather_kernel,
                out_shape=out_shape,
                grid_spec=pltpu.PrefetchScalarGridSpec(
                    num_scalar_prefetch=0,
                    grid=grid,
                    in_specs=[
                        pl.BlockSpec((block_n, 1), lambda i: (i, 0)),
                        _invariant_spec((1, v_pad), single_buffer=single_buffer),
                        _invariant_spec((v_pad, D), single_buffer=single_buffer),
                    ],
                    out_specs=out_spec,
                ),
                compiler_params=compiler_params,
                cost_estimate=pl.CostEstimate(
                    flops=2 * n_pad * v_pad * D,
                    transcendentals=0,
                    bytes_accessed=n_pad * D * esize + table_bytes + n_pad * 4,
                ),
            )
            return call(idx.reshape(n_pad, 1), iota_row, table)
        else:
            call = pl.pallas_call(
                _row_gather_kernel,
                out_shape=out_shape,
                grid_spec=pltpu.PrefetchScalarGridSpec(
                    num_scalar_prefetch=1,  # indices live in SMEM (lane-dense)
                    grid=grid,
                    in_specs=[
                        _invariant_spec((V, D), single_buffer=single_buffer),
                    ],
                    out_specs=out_spec,
                ),
                compiler_params=compiler_params,
                cost_estimate=pl.CostEstimate(
                    flops=0,
                    transcendentals=0,
                    bytes_accessed=2 * n_pad * D * esize + table_bytes + n_pad * 4,
                ),
            )
            return call(idx, table)

    try:
        out_pad = run(single_buffer=True)
    except Exception:
        # pl.Buffered(1) not supported by this jax/libtpu combo: fall back to
        # default double-buffered specs (identical results, more VMEM).
        out_pad = run(single_buffer=False)

    return out_pad[:N].reshape(B, L, D)


if __name__ == "__main__":
    # SkipGram(v_size, d_size): forward() only uses the embedding lookup.
    # (linear / logsoftmax / softmax / NLLLoss exist in __init__ but are unused.)
    B, L = 2, 8       # batch, sequence length
    D_SIZE = 128      # hidden / embedding size (lane-dense)

    key = jax.random.PRNGKey(0)
    k_small, k_big, k_x1, k_x2 = jax.random.split(key, 4)

    # --- tiny vocab -> one-hot MXU path --------------------------------------
    V_SMALL = 64
    table_small = jax.random.normal(k_small, (V_SMALL, D_SIZE), dtype=jnp.float32)
    x_small = jax.random.randint(k_x1, (B, L), 0, V_SMALL, dtype=jnp.int32)
    out_small = skipgram_forward(x_small, table_small)
    jax.block_until_ready(out_small)
    assert out_small.shape == (B, L, D_SIZE)
    assert jnp.allclose(out_small, table_small[x_small], rtol=1e-6, atol=1e-6), \
        "one-hot path mismatch vs reference gather"

    # --- larger vocab -> exact row-gather path --------------------------------
    V_BIG = 2048
    table_big = jax.random.normal(k_big, (V_BIG, D_SIZE), dtype=jnp.float32)
    x_big = jax.random.randint(k_x2, (B, L), 0, V_BIG, dtype=jnp.int32)
    out_big = skipgram_forward(x_big, table_big)
    jax.block_until_ready(out_big)
    assert out_big.shape == (B, L, D_SIZE)
    assert jnp.allclose(out_big, table_big[x_big]), \
        "row-gather path mismatch vs reference gather"

    print("KERNEL_OK")
</pallas_src>

<mosaic_0001>
module attributes {stable_mosaic.version = 11 : i64} {
  func.func @_one_hot_gather_kernel(%arg0: i32, %arg1: memref<16x1xi32, #tpu.memory_space<vmem>>, %arg2: memref<1x256xi32, #tpu.memory_space<vmem>>, %arg3: memref<256x128xf32, #tpu.memory_space<vmem>>, %arg4: memref<16x128xf32, #tpu.memory_space<vmem>>) attributes {dimension_semantics = [#tpu.dimension_semantics<parallel>], iteration_bounds = array<i64: 1>, scalar_prefetch = 0 : i64, scratch_operands = 0 : i64, tpu.core_type = #tpu.core_type<tc>, window_params = [{transform_indices = @transform_0, window_bounds = array<i64: 16, 1>}, {pipeline_mode = #tpu.pipeline_mode<synchronous>, transform_indices = @transform_1, window_bounds = array<i64: 1, 256>}, {pipeline_mode = #tpu.pipeline_mode<synchronous>, transform_indices = @transform_2, window_bounds = array<i64: 256, 128>}, {transform_indices = @transform_3, window_bounds = array<i64: 16, 128>}]} {
    %c0 = arith.constant 0 : index
    %c0_0 = arith.constant 0 : index
    %0 = vector.load %arg1[%c0, %c0_0] : memref<16x1xi32, #tpu.memory_space<vmem>>, vector<16x1xi32>
    %c0_1 = arith.constant 0 : index
    %c0_2 = arith.constant 0 : index
    %1 = vector.load %arg2[%c0_1, %c0_2] : memref<1x256xi32, #tpu.memory_space<vmem>>, vector<1x256xi32>
    %2 = vector.broadcast %0 : vector<16x1xi32> to vector<16x256xi32>
    %3 = vector.broadcast %1 : vector<1x256xi32> to vector<16x256xi32>
    %4 = arith.cmpi eq, %2, %3 : vector<16x256xi32>
    %5 = arith.extui %4 : vector<16x256xi1> to vector<16x256xi32>
    %6 = arith.sitofp %5 : vector<16x256xi32> to vector<16x256xf32>
    %c0_3 = arith.constant 0 : index
    %c0_4 = arith.constant 0 : index
    %7 = vector.load %arg3[%c0_3, %c0_4] : memref<256x128xf32, #tpu.memory_space<vmem>>, vector<256x128xf32>
    %cst = arith.constant dense<0.000000e+00> : vector<16x128xf32>
    %8 = tpu.matmul %6, %7, %cst {dimension_numbers = #tpu.dot_dimension_numbers<[1], [0], [0], [1], [0, 0, 1, 1], [], []>} : vector<16x256xf32>, vector<256x128xf32>, vector<16x128xf32> -> vector<16x128xf32>
    %c0_5 = arith.constant 0 : index
    %c0_6 = arith.constant 0 : index
    %9 = vector.load %arg4[%c0_5, %c0_6] : memref<16x128xf32, #tpu.memory_space<vmem>>, vector<16x128xf32>
    tpu.vector_store %arg4[%c0_5, %c0_6], %8 {strides = array<i32>} : memref<16x128xf32, #tpu.memory_space<vmem>>, vector<16x128xf32>,
    return
  }
  func.func @transform_0(%arg0: i32) -> (i32, i32) {
    %c0_i32 = arith.constant 0 : i32
    %c0_i32_0 = arith.constant 0 : i32
    return %arg0, %c0_i32 : i32, i32
  }
  func.func @transform_1(%arg0: i32) -> (i32, i32) {
    %c0_i32 = arith.constant 0 : i32
    %c0_i32_0 = arith.constant 0 : i32
    %c0_i32_1 = arith.constant 0 : i32
    return %c0_i32, %c0_i32_0 : i32, i32
  }
  func.func @transform_2(%arg0: i32) -> (i32, i32) {
    %c0_i32 = arith.constant 0 : i32
    %c0_i32_0 = arith.constant 0 : i32
    %c0_i32_1 = arith.constant 0 : i32
    return %c0_i32, %c0_i32_0 : i32, i32
  }
  func.func @transform_3(%arg0: i32) -> (i32, i32) {
    %c0_i32 = arith.constant 0 : i32
    %c0_i32_0 = arith.constant 0 : i32
    return %arg0, %c0_i32 : i32, i32
  }
}

module attributes {stable_mosaic.version = 11 : i64} {
  func.func @_one_hot_gather_kernel(%arg0: i32, %arg1: memref<16x1xi32, #tpu.memory_space<vmem>>, %arg2: memref<1x256xi32, #tpu.memory_space<vmem>>, %arg3: memref<256x128xf32, #tpu.memory_space<vmem>>, %arg4: memref<16x128xf32, #tpu.memory_space<vmem>>) attributes {dimension_semantics = [#tpu.dimension_semantics<parallel>], iteration_bounds = array<i64: 1>, scalar_prefetch = 0 : i64, scratch_operands = 0 : i64, tpu.core_type = #tpu.core_type<tc>, window_params = [{transform_indices = @transform_0, window_bounds = array<i64: 16, 1>}, {pipeline_mode = #tpu.pipeline_mode<synchronous>, transform_indices = @transform_1, window_bounds = array<i64: 1, 256>}, {pipeline_mode = #tpu.pipeline_mode<synchronous>, transform_indices = @transform_2, window_bounds = array<i64: 256, 128>}, {transform_indices = @transform_3, window_bounds = array<i64: 16, 128>}]} {
    %c0 = arith.constant 0 : index
    %c0_0 = arith.constant 0 : index
    %0 = vector.load %arg1[%c0, %c0_0] : memref<16x1xi32, #tpu.memory_space<vmem>>, vector<16x1xi32>
    %c0_1 = arith.constant 0 : index
    %c0_2 = arith.constant 0 : index
    %1 = vector.load %arg2[%c0_1, %c0_2] : memref<1x256xi32, #tpu.memory_space<vmem>>, vector<1x256xi32>
    %2 = vector.broadcast %0 : vector<16x1xi32> to vector<16x256xi32>
    %3 = vector.broadcast %1 : vector<1x256xi32> to vector<16x256xi32>
    %4 = arith.cmpi eq, %2, %3 : vector<16x256xi32>
    %5 = arith.extui %4 : vector<16x256xi1> to vector<16x256xi32>
    %6 = arith.sitofp %5 : vector<16x256xi32> to vector<16x256xf32>
    %c0_3 = arith.constant 0 : index
    %c0_4 = arith.constant 0 : index
    %7 = vector.load %arg3[%c0_3, %c0_4] : memref<256x128xf32, #tpu.memory_space<vmem>>, vector<256x128xf32>
    %cst = arith.constant dense<0.000000e+00> : vector<16x128xf32>
    %8 = tpu.matmul %6, %7, %cst {dimension_numbers = #tpu.dot_dimension_numbers<[1], [0], [0], [1], [0, 0, 1, 1], [], []>} : vector<16x256xf32>, vector<256x128xf32>, vector<16x128xf32> -> vector<16x128xf32>
    %c0_5 = arith.constant 0 : index
    %c0_6 = arith.constant 0 : index
    %9 = vector.load %arg4[%c0_5, %c0_6] : memref<16x128xf32, #tpu.memory_space<vmem>>, vector<16x128xf32>
    tpu.vector_store %arg4[%c0_5, %c0_6], %8 {strides = array<i32>} : memref<16x128xf32, #tpu.memory_space<vmem>>, vector<16x128xf32>,
    return
  }
  func.func @transform_0(%arg0: i32) -> (i32, i32) {
    %c0_i32 = arith.constant 0 : i32
    %c0_i32_0 = arith.constant 0 : i32
    return %arg0, %c0_i32 : i32, i32
  }
  func.func @transform_1(%arg0: i32) -> (i32, i32) {
    %c0_i32 = arith.constant 0 : i32
    %c0_i32_0 = arith.constant 0 : i32
    %c0_i32_1 = arith.constant 0 : i32
    return %c0_i32, %c0_i32_0 : i32, i32
  }
  func.func @transform_2(%arg0: i32) -> (i32, i32) {
    %c0_i32 = arith.constant 0 : i32
    %c0_i32_0 = arith.constant 0 : i32
    %c0_i32_1 = arith.constant 0 : i32
    return %c0_i32, %c0_i32_0 : i32, i32
  }
  func.func @transform_3(%arg0: i32) -> (i32, i32) {
    %c0_i32 = arith.constant 0 : i32
    %c0_i32_0 = arith.constant 0 : i32
    return %arg0, %c0_i32 : i32, i32
  }
}

</mosaic_0001>

<bundles_post_ra>
// kernel: tpu_custom_call.1
= control target key start
LH: loop header
LB: loop body
LE: loop exit
PB: predicated region body
PF: predicated region fallthrough
CT: control target
= control target key end

     0   :  { %8 = vsyncpa [#allocation3], 0  ;;  %s398_s0 = inlined_call_operand.vmem [shape: s32[16,1], index: 0, kind: input, shape index: {}]   ;;  %s399_s1 = inlined_call_operand.vmem [shape: s32[1,256], index: 1, kind: input, shape index: {}]   ;;  %s400_s2 = inlined_call_operand.hbm [shape: f32[256,128], index: 2, kind: input, shape index: {}]   ;;  %s401_s3 = inlined_call_operand.hbm [shape: f32[16,128], index: 3, kind: output, shape index: {}]  }
   0x1   :  { %9 = vsyncpa [#allocation4], 0  ;;  %s333_s12 = smov [#allocation2]   ;;  %s285_s16 = scalar_lea.hbm %s400_s2, 4096 }
   0x2   :  { %s19_s13 = sshll.u32 %s333_s12, 4  ;;  %p286_p0 = scmp.ne.s32.totalorder %s400_s2, %s285_s16  ;;  %s20_s13 = int_to_ptr.vmem [resolvable:$true] %s19_s13 }
   0x3   :  { %p289_p1 = scmp.lt.u32.totalorder %s285_s16, %s400_s2 }
   0x5   :  { %p291_p2 = pnand %p289_p1, %p286_p0 }
   0x7   :  { %294 = shalt.err (!%p291_p2)
}
   0x8   :  { %s295_s21 = scalar_lea.vmem %s20_s13, 4096  ;;  %p300_p4 = scmp.lt.s32.totalorder %s20_s13, %s20_s13 }
   0x9   :  { %p296_p3 = scmp.ne.s32.totalorder %s20_s13, %s295_s21  ;;  %p301_p5 = scmp.lt.s32.totalorder %s295_s21, %s295_s21 }
   0xb   :  { %p302_p6 = por %p301_p5, %p300_p4 }
   0xd   :  { %p303_p7 = pnand %p302_p6, %p296_p3 }
   0xf   :  { %306 = shalt.err (!%p303_p7)
}
  0x10   :  { %s334_s22 = smov 128   ;;  %s335_s23 = smov 8  }
  0x11   :  { %25 = dma.hbm_to_vmem [thread:$0]  %s400_s2, 4096, %s20_s13, [#allocation3], %s334_s22, %s334_s22, %s335_s23  }
  0x12   :  { %329 = dma.done.wait [#allocation3], 4096  }
  0x13   :  { %330 = vsyncadd [#allocation3], 4294963200  ;;  %v336_v0 = vmov 0   ;;  %v29_v1 = vld [vmem:[%s398_s0] sm:$0xff]  ;;  %v30_v2 = vld [vmem:[%s398_s0 + $0x8] sm:$0xff]  ;;  %v38_v51 = vlaneseq  ;;  %v337_v59 = vmov 1.0  }
  0x14   :  { %284 = vset.pattern.permute.xlu0 %v336_v0  ;;  %v74_v3 = vld [vmem:[#allocation2 + $0x80] sm:$0xff]  ;;  %v75_v4 = vld [vmem:[#allocation2 + $0x88] sm:$0xff]  ;;  %v76_v9 = vld [vmem:[#allocation2 + $0x90] sm:$0xff]  ;;  %s338_s30 = smov [#allocation5]  }
  0x15   :  { %33 = vperm.xlu0 %284, %v29_v1   ;;  %v58_v5 = vld [vmem:[#allocation2] sm:$0xff]  ;;  %v59_v6 = vld [vmem:[#allocation2 + $0x8] sm:$0xff]  ;;  %v230_v7 = vpack.c.bf16 %v75_v4, %v74_v3  ;;  %v77_v10 = vld [vmem:[#allocation2 + $0x98] sm:$0xff]  ;;  %v39_v52 = vshrl.u32 %v38_v51, 7  ;;  %s172_s4 = sshll.u32 %s338_s30, 4  ;;  %s173_s4 = int_to_ptr.vmem [resolvable:$true] %s172_s4 }
  0x16   :  { %v232_v8 = vpack.c.bf16 %v59_v6, %v58_v5  ;;  %v60_v11 = vld [vmem:[#allocation2 + $0x10] sm:$0xff]  ;;  %v234_v12 = vpack.c.bf16 %v77_v10, %v76_v9  ;;  %v61_v13 = vld [vmem:[#allocation2 + $0x18] sm:$0xff]  ;;  %v78_v14 = vld [vmem:[#allocation2 + $0xa0] sm:$0xff]  ;;  %p312_p9 = scmp.lt.s32.totalorder %s173_s4, %s173_s4 }
  0x17   :  { %v79_v15 = vld [vmem:[#allocation2 + $0xa8] sm:$0xff]  ;;  %231 = vmatprep.subr.bf16.mxu0 %v230_v7  ;;  %262 = vmatprep.subr.bf16.mxu1 %v230_v7  ;;  %v236_v16 = vpack.c.bf16 %v61_v13, %v60_v11  ;;  %v62_v18 = vld [vmem:[#allocation2 + $0x20] sm:$0xff]  ;;  %v80_v20 = vld [vmem:[#allocation2 + $0xb0] sm:$0xff]  ;;  %v40_v53 = vsub.s32 0, %v39_v52  ;;  %v44_v54 = vsub.s32 1, %v39_v52 }
  0x18   :  { %233 = vmatpush3.bf16.msra.mxu0 %v232_v8  ;;  %270 = vmatpush3.bf16.msra.mxu1 %v232_v8  ;;  %v238_v17 = vpack.c.bf16 %v79_v15, %v78_v14  ;;  %v63_v19 = vld [vmem:[#allocation2 + $0x28] sm:$0xff]  ;;  %v81_v21 = vld [vmem:[#allocation2 + $0xb8] sm:$0xff]  ;;  %v64_v24 = vld [vmem:[#allocation2 + $0x30] sm:$0xff] }
  0x19   :  { %36 = vperm.xlu0 %284, %v30_v2   ;;  %235 = vmatprep.subr.bf16.mxu0 %v234_v12  ;;  %v240_v22 = vpack.c.bf16 %v63_v19, %v62_v18  ;;  %v242_v23 = vpack.c.bf16 %v81_v21, %v80_v20  ;;  %v65_v25 = vld [vmem:[#allocation2 + $0x38] sm:$0xff]  ;;  %v82_v26 = vld [vmem:[#allocation2 + $0xc0] sm:$0xff]  ;;  %v83_v27 = vld [vmem:[#allocation2 + $0xc8] sm:$0xff] }
  0x1a   :  { %263 = vmatprep.subr.bf16.mxu1 %v234_v12  ;;  %v244_v28 = vpack.c.bf16 %v65_v25, %v64_v24  ;;  %v246_v29 = vpack.c.bf16 %v83_v27, %v82_v26  ;;  %v66_v30 = vld [vmem:[#allocation2 + $0x40] sm:$0xff]  ;;  %v67_v31 = vld [vmem:[#allocation2 + $0x48] sm:$0xff]  ;;  %v84_v32 = vld [vmem:[#allocation2 + $0xd0] sm:$0xff] }
  0x1b   :  { %v85_v33 = vld [vmem:[#allocation2 + $0xd8] sm:$0xff]  ;;  %v248_v34 = vpack.c.bf16 %v67_v31, %v66_v30  ;;  %v68_v36 = vld [vmem:[#allocation2 + $0x50] sm:$0xff]  ;;  %v86_v38 = vld [vmem:[#allocation2 + $0xe0] sm:$0xff] }
  0x1c   :  { %237 = vmatpush3.bf16.msra.mxu0 %v236_v16  ;;  %271 = vmatpush3.bf16.msra.mxu1 %v236_v16  ;;  %v250_v35 = vpack.c.bf16 %v85_v33, %v84_v32  ;;  %v69_v37 = vld [vmem:[#allocation2 + $0x58] sm:$0xff]  ;;  %v87_v39 = vld [vmem:[#allocation2 + $0xe8] sm:$0xff]  ;;  %v70_v42 = vld [vmem:[#allocation2 + $0x60] sm:$0xff] }
  0x1d   :  { %239 = vmatprep.subr.bf16.mxu0 %v238_v17  ;;  %264 = vmatprep.subr.bf16.mxu1 %v238_v17  ;;  %v252_v40 = vpack.c.bf16 %v69_v37, %v68_v36  ;;  %v254_v41 = vpack.c.bf16 %v87_v39, %v86_v38  ;;  %v71_v43 = vld [vmem:[#allocation2 + $0x68] sm:$0xff]  ;;  %v88_v44 = vld [vmem:[#allocation2 + $0xf0] sm:$0xff]  ;;  %v89_v45 = vld [vmem:[#allocation2 + $0xf8] sm:$0xff] }
  0x1e   :  { %v256_v46 = vpack.c.bf16 %v71_v43, %v70_v42  ;;  %v258_v47 = vpack.c.bf16 %v89_v45, %v88_v44  ;;  %v72_v48 = vld [vmem:[#allocation2 + $0x70] sm:$0xff]  ;;  %v73_v49 = vld [vmem:[#allocation2 + $0x78] sm:$0xff]  ;;  %v31_v55 = vld [vmem:[%s399_s1] sm:$0x3]  ;;  %s307_s1 = scalar_lea.vmem %s173_s4, 256 }
  0x1f   :  { %v260_v50 = vpack.c.bf16 %v73_v49, %v72_v48  ;;  %v41_v56 = vrot.slane %v31_v55, %v40_v53  ;;  %v45_v57 = vrot.slane %v31_v55, %v44_v54  ;;  %p308_p8 = scmp.ne.s32.totalorder %s173_s4, %s307_s1  ;;  %p313_p10 = scmp.lt.s32.totalorder %s307_s1, %s307_s1 }
  0x20   :  { %241 = vmatpush3.bf16.msra.mxu0 %v240_v22  ;;  %272 = vmatpush3.bf16.msra.mxu1 %v240_v22 }
  0x21   :  { %243 = vmatprep.subr.bf16.mxu0 %v242_v23  ;;  %265 = vmatprep.subr.bf16.mxu1 %v242_v23  ;;  %p314_p11 = por %p313_p10, %p312_p9 }
  0x23   :  { %p315_p12 = pnand %p314_p11, %p308_p8 }
  0x24   :  { %245 = vmatpush3.bf16.msra.mxu0 %v244_v28  ;;  %273 = vmatpush3.bf16.msra.mxu1 %v244_v28 }
  0x25   :  { %247 = vmatprep.subr.bf16.mxu0 %v246_v29  ;;  %266 = vmatprep.subr.bf16.mxu1 %v246_v29 }
  0x28   :  { %249 = vmatpush3.bf16.msra.mxu0 %v248_v34  ;;  %274 = vmatpush3.bf16.msra.mxu1 %v248_v34 }
  0x29   :  { %251 = vmatprep.subr.bf16.mxu0 %v250_v35  ;;  %267 = vmatprep.subr.bf16.mxu1 %v250_v35 }
  0x2c   :  { %253 = vmatpush3.bf16.msra.mxu0 %v252_v40  ;;  %275 = vmatpush3.bf16.msra.mxu1 %v252_v40 }
  0x2d   :  { %255 = vmatprep.subr.bf16.mxu0 %v254_v41  ;;  %268 = vmatprep.subr.bf16.mxu1 %v254_v41 }
  0x30   :  { %257 = vmatpush3.bf16.msra.mxu0 %v256_v46  ;;  %276 = vmatpush3.bf16.msra.mxu1 %v256_v46 }
  0x31   :  { %259 = vmatprep.subr.bf16.mxu0 %v258_v47  ;;  %269 = vmatprep.subr.bf16.mxu1 %v258_v47 }
  0x34   :  { %261 = vmatpush3.bf16.msra.mxu0 %v260_v50  ;;  %277 = vmatpush3.bf16.msra.mxu1 %v260_v50 }
  0x94   :  { %v34_v58 = vpop.permute.xlu0 %33 }
  0x95   :  { %vm46_vm0 = vcmp.eq.s32.totalorder %v34_v58, %v41_v56  ;;  %vm47_vm1 = vcmp.eq.s32.totalorder %v34_v58, %v45_v57 }
  0x96   :  { %188 = vmatprep.mubr.msk.f32.mxu0 %vm47_vm1, %v337_v59 }
  0x97   :  { %189 = vmatmul.mubr.msk.f32.vlgmr.msra.gmra.mrb[0].mxu0 %vm46_vm0, %v337_v59 }
  0x98   :  { %v37_v60 = vpop.permute.xlu0 %36 }
  0x99   :  { %vm48_vm2 = vcmp.eq.s32.totalorder %v37_v60, %v41_v56  ;;  %vm49_vm3 = vcmp.eq.s32.totalorder %v37_v60, %v45_v57 }
  0x9a   :  { %190 = vmatprep.mubr.msk.f32.mxu1 %vm49_vm3, %v337_v59 }
  0x9b   :  { %191 = vmatmul.mubr.msk.f32.vlgmr.msra.gmra.mrb[0].mxu1 %vm48_vm2, %v337_v59 }
 0x16a   :  { %v224_v61 = vpop.f32.mrb[0].mxu0 }
 0x16b   :  { %v225_v62 = vpop.f32.mrb[1].mxu0 }
 0x16c   :  { %v226_v63 = vadd.f32 %v225_v62, %v224_v61 }
 0x16e   :  { %165 = vst [vmem:[#allocation5] sm:$0xff] %v226_v63  ;;  %v227_v0 = vpop.f32.mrb[0].mxu1 }
 0x16f   :  { %v228_v1 = vpop.f32.mrb[1].mxu1 }
 0x170   :  { %v229_v2 = vadd.f32 %v228_v1, %v227_v0 }
 0x172   :  { %166 = vst [vmem:[#allocation5 + $0x8] sm:$0xff] %v229_v2 }
 0x173   :  { %318 = shalt.err (!%p315_p12)
}
 0x174   :  { %s319_s7 = scalar_lea.hbm %s401_s3, 256 }
 0x175   :  { %p320_p13 = scmp.ne.s32.totalorder %s401_s3, %s319_s7  ;;  %p323_p0 = scmp.lt.u32.totalorder %s319_s7, %s401_s3 }
 0x177   :  { %p325_p1 = pnand %p323_p0, %p320_p13 }
 0x179   :  { %328 = shalt.err (!%p325_p1)
}
 0x17a   :  { %178 = dma.vmem_to_hbm [thread:$0]  %s173_s4, 256, %s401_s3, [#allocation4], %s334_s22, %s334_s22, %s335_s23  }
 0x17b   :  { %331 = dma.done.wait [#allocation4], 256  }
 0x17c   :  { %332 = vsyncadd [#allocation4], 4294967040 }
 0x17d   :  { %182 = vsyncpa [#allocation3], 1 }
 0x17e   :  { %183 = vsyncpa [#allocation4], 1 }

// kernel: tpu_custom_call.1
= control target key start
LH: loop header
LB: loop body
LE: loop exit
PB: predicated region body
PF: predicated region fallthrough
CT: control target
= control target key end

     0   :  { %8 = vsyncpa [#allocation3], 0  ;;  %s398_s0 = inlined_call_operand.vmem [shape: s32[16,1], index: 0, kind: input, shape index: {}]   ;;  %s399_s1 = inlined_call_operand.vmem [shape: s32[1,256], index: 1, kind: input, shape index: {}]   ;;  %s400_s2 = inlined_call_operand.hbm [shape: f32[256,128], index: 2, kind: input, shape index: {}]   ;;  %s401_s3 = inlined_call_operand.hbm [shape: f32[16,128], index: 3, kind: output, shape index: {}]  }
   0x1   :  { %9 = vsyncpa [#allocation4], 0  ;;  %s333_s12 = smov [#allocation2]   ;;  %s285_s16 = scalar_lea.hbm %s400_s2, 4096 }
   0x2   :  { %s19_s13 = sshll.u32 %s333_s12, 4  ;;  %p286_p0 = scmp.ne.s32.totalorder %s400_s2, %s285_s16  ;;  %s20_s13 = int_to_ptr.vmem [resolvable:$true] %s19_s13 }
   0x3   :  { %p289_p1 = scmp.lt.u32.totalorder %s285_s16, %s400_s2 }
   0x5   :  { %p291_p2 = pnand %p289_p1, %p286_p0 }
   0x7   :  { %294 = shalt.err (!%p291_p2)
}
   0x8   :  { %s295_s21 = scalar_lea.vmem %s20_s13, 4096  ;;  %p300_p4 = scmp.lt.s32.totalorder %s20_s13, %s20_s13 }
   0x9   :  { %p296_p3 = scmp.ne.s32.totalorder %s20_s13, %s295_s21  ;;  %p301_p5 = scmp.lt.s32.totalorder %s295_s21, %s295_s21 }
   0xb   :  { %p302_p6 = por %p301_p5, %p300_p4 }
   0xd   :  { %p303_p7 = pnand %p302_p6, %p296_p3 }
   0xf   :  { %306 = shalt.err (!%p303_p7)
}
  0x10   :  { %s334_s22 = smov 128   ;;  %s335_s23 = smov 8  }
  0x11   :  { %25 = dma.hbm_to_vmem [thread:$0]  %s400_s2, 4096, %s20_s13, [#allocation3], %s334_s22, %s334_s22, %s335_s23  }
  0x12   :  { %329 = dma.done.wait [#allocation3], 4096  }
  0x13   :  { %330 = vsyncadd [#allocation3], 4294963200  ;;  %v336_v0 = vmov 0   ;;  %v29_v1 = vld [vmem:[%s398_s0] sm:$0xff]  ;;  %v30_v2 = vld [vmem:[%s398_s0 + $0x8] sm:$0xff]  ;;  %v38_v51 = vlaneseq  ;;  %v337_v59 = vmov 1.0  }
  0x14   :  { %284 = vset.pattern.permute.xlu0 %v336_v0  ;;  %v74_v3 = vld [vmem:[#allocation2 + $0x80] sm:$0xff]  ;;  %v75_v4 = vld [vmem:[#allocation2 + $0x88] sm:$0xff]  ;;  %v76_v9 = vld [vmem:[#allocation2 + $0x90] sm:$0xff]  ;;  %s338_s30 = smov [#allocation5]  }
  0x15   :  { %33 = vperm.xlu0 %284, %v29_v1   ;;  %v58_v5 = vld [vmem:[#allocation2] sm:$0xff]  ;;  %v59_v6 = vld [vmem:[#allocation2 + $0x8] sm:$0xff]  ;;  %v230_v7 = vpack.c.bf16 %v75_v4, %v74_v3  ;;  %v77_v10 = vld [vmem:[#allocation2 + $0x98] sm:$0xff]  ;;  %v39_v52 = vshrl.u32 %v38_v51, 7  ;;  %s172_s4 = sshll.u32 %s338_s30, 4  ;;  %s173_s4 = int_to_ptr.vmem [resolvable:$true] %s172_s4 }
  0x16   :  { %v232_v8 = vpack.c.bf16 %v59_v6, %v58_v5  ;;  %v60_v11 = vld [vmem:[#allocation2 + $0x10] sm:$0xff]  ;;  %v234_v12 = vpack.c.bf16 %v77_v10, %v76_v9  ;;  %v61_v13 = vld [vmem:[#allocation2 + $0x18] sm:$0xff]  ;;  %v78_v14 = vld [vmem:[#allocation2 + $0xa0] sm:$0xff]  ;;  %p312_p9 = scmp.lt.s32.totalorder %s173_s4, %s173_s4 }
  0x17   :  { %v79_v15 = vld [vmem:[#allocation2 + $0xa8] sm:$0xff]  ;;  %231 = vmatprep.subr.bf16.mxu0 %v230_v7  ;;  %262 = vmatprep.subr.bf16.mxu1 %v230_v7  ;;  %v236_v16 = vpack.c.bf16 %v61_v13, %v60_v11  ;;  %v62_v18 = vld [vmem:[#allocation2 + $0x20] sm:$0xff]  ;;  %v80_v20 = vld [vmem:[#allocation2 + $0xb0] sm:$0xff]  ;;  %v40_v53 = vsub.s32 0, %v39_v52  ;;  %v44_v54 = vsub.s32 1, %v39_v52 }
  0x18   :  { %233 = vmatpush3.bf16.msra.mxu0 %v232_v8  ;;  %270 = vmatpush3.bf16.msra.mxu1 %v232_v8  ;;  %v238_v17 = vpack.c.bf16 %v79_v15, %v78_v14  ;;  %v63_v19 = vld [vmem:[#allocation2 + $0x28] sm:$0xff]  ;;  %v81_v21 = vld [vmem:[#allocation2 + $0xb8] sm:$0xff]  ;;  %v64_v24 = vld [vmem:[#allocation2 + $0x30] sm:$0xff] }
  0x19   :  { %36 = vperm.xlu0 %284, %v30_v2   ;;  %235 = vmatprep.subr.bf16.mxu0 %v234_v12  ;;  %v240_v22 = vpack.c.bf16 %v63_v19, %v62_v18  ;;  %v242_v23 = vpack.c.bf16 %v81_v21, %v80_v20  ;;  %v65_v25 = vld [vmem:[#allocation2 + $0x38] sm:$0xff]  ;;  %v82_v26 = vld [vmem:[#allocation2 + $0xc0] sm:$0xff]  ;;  %v83_v27 = vld [vmem:[#allocation2 + $0xc8] sm:$0xff] }
  0x1a   :  { %263 = vmatprep.subr.bf16.mxu1 %v234_v12  ;;  %v244_v28 = vpack.c.bf16 %v65_v25, %v64_v24  ;;  %v246_v29 = vpack.c.bf16 %v83_v27, %v82_v26  ;;  %v66_v30 = vld [vmem:[#allocation2 + $0x40] sm:$0xff]  ;;  %v67_v31 = vld [vmem:[#allocation2 + $0x48] sm:$0xff]  ;;  %v84_v32 = vld [vmem:[#allocation2 + $0xd0] sm:$0xff] }
  0x1b   :  { %v85_v33 = vld [vmem:[#allocation2 + $0xd8] sm:$0xff]  ;;  %v248_v34 = vpack.c.bf16 %v67_v31, %v66_v30  ;;  %v68_v36 = vld [vmem:[#allocation2 + $0x50] sm:$0xff]  ;;  %v86_v38 = vld [vmem:[#allocation2 + $0xe0] sm:$0xff] }
  0x1c   :  { %237 = vmatpush3.bf16.msra.mxu0 %v236_v16  ;;  %271 = vmatpush3.bf16.msra.mxu1 %v236_v16  ;;  %v250_v35 = vpack.c.bf16 %v85_v33, %v84_v32  ;;  %v69_v37 = vld [vmem:[#allocation2 + $0x58] sm:$0xff]  ;;  %v87_v39 = vld [vmem:[#allocation2 + $0xe8] sm:$0xff]  ;;  %v70_v42 = vld [vmem:[#allocation2 + $0x60] sm:$0xff] }
  0x1d   :  { %239 = vmatprep.subr.bf16.mxu0 %v238_v17  ;;  %264 = vmatprep.subr.bf16.mxu1 %v238_v17  ;;  %v252_v40 = vpack.c.bf16 %v69_v37, %v68_v36  ;;  %v254_v41 = vpack.c.bf16 %v87_v39, %v86_v38  ;;  %v71_v43 = vld [vmem:[#allocation2 + $0x68] sm:$0xff]  ;;  %v88_v44 = vld [vmem:[#allocation2 + $0xf0] sm:$0xff]  ;;  %v89_v45 = vld [vmem:[#allocation2 + $0xf8] sm:$0xff] }
  0x1e   :  { %v256_v46 = vpack.c.bf16 %v71_v43, %v70_v42  ;;  %v258_v47 = vpack.c.bf16 %v89_v45, %v88_v44  ;;  %v72_v48 = vld [vmem:[#allocation2 + $0x70] sm:$0xff]  ;;  %v73_v49 = vld [vmem:[#allocation2 + $0x78] sm:$0xff]  ;;  %v31_v55 = vld [vmem:[%s399_s1] sm:$0x3]  ;;  %s307_s1 = scalar_lea.vmem %s173_s4, 256 }
  0x1f   :  { %v260_v50 = vpack.c.bf16 %v73_v49, %v72_v48  ;;  %v41_v56 = vrot.slane %v31_v55, %v40_v53  ;;  %v45_v57 = vrot.slane %v31_v55, %v44_v54  ;;  %p308_p8 = scmp.ne.s32.totalorder %s173_s4, %s307_s1  ;;  %p313_p10 = scmp.lt.s32.totalorder %s307_s1, %s307_s1 }
  0x20   :  { %241 = vmatpush3.bf16.msra.mxu0 %v240_v22  ;;  %272 = vmatpush3.bf16.msra.mxu1 %v240_v22 }
  0x21   :  { %243 = vmatprep.subr.bf16.mxu0 %v242_v23  ;;  %265 = vmatprep.subr.bf16.mxu1 %v242_v23  ;;  %p314_p11 = por %p313_p10, %p312_p9 }
  0x23   :  { %p315_p12 = pnand %p314_p11, %p308_p8 }
  0x24   :  { %245 = vmatpush3.bf16.msra.mxu0 %v244_v28  ;;  %273 = vmatpush3.bf16.msra.mxu1 %v244_v28 }
  0x25   :  { %247 = vmatprep.subr.bf16.mxu0 %v246_v29  ;;  %266 = vmatprep.subr.bf16.mxu1 %v246_v29 }
  0x28   :  { %249 = vmatpush3.bf16.msra.mxu0 %v248_v34  ;;  %274 = vmatpush3.bf16.msra.mxu1 %v248_v34 }
  0x29   :  { %251 = vmatprep.subr.bf16.mxu0 %v250_v35  ;;  %267 = vmatprep.subr.bf16.mxu1 %v250_v35 }
  0x2c   :  { %253 = vmatpush3.bf16.msra.mxu0 %v252_v40  ;;  %275 = vmatpush3.bf16.msra.mxu1 %v252_v40 }
  0x2d   :  { %255 = vmatprep.subr.bf16.mxu0 %v254_v41  ;;  %268 = vmatprep.subr.bf16.mxu1 %v254_v41 }
  0x30   :  { %257 = vmatpush3.bf16.msra.mxu0 %v256_v46  ;;  %276 = vmatpush3.bf16.msra.mxu1 %v256_v46 }
  0x31   :  { %259 = vmatprep.subr.bf16.mxu0 %v258_v47  ;;  %269 = vmatprep.subr.bf16.mxu1 %v258_v47 }
  0x34   :  { %261 = vmatpush3.bf16.msra.mxu0 %v260_v50  ;;  %277 = vmatpush3.bf16.msra.mxu1 %v260_v50 }
  0x94   :  { %v34_v58 = vpop.permute.xlu0 %33 }
  0x95   :  { %vm46_vm0 = vcmp.eq.s32.totalorder %v34_v58, %v41_v56  ;;  %vm47_vm1 = vcmp.eq.s32.totalorder %v34_v58, %v45_v57 }
  0x96   :  { %188 = vmatprep.mubr.msk.f32.mxu0 %vm47_vm1, %v337_v59 }
  0x97   :  { %189 = vmatmul.mubr.msk.f32.vlgmr.msra.gmra.mrb[0].mxu0 %vm46_vm0, %v337_v59 }
  0x98   :  { %v37_v60 = vpop.permute.xlu0 %36 }
  0x99   :  { %vm48_vm2 = vcmp.eq.s32.totalorder %v37_v60, %v41_v56  ;;  %vm49_vm3 = vcmp.eq.s32.totalorder %v37_v60, %v45_v57 }
  0x9a   :  { %190 = vmatprep.mubr.msk.f32.mxu1 %vm49_vm3, %v337_v59 }
  0x9b   :  { %191 = vmatmul.mubr.msk.f32.vlgmr.msra.gmra.mrb[0].mxu1 %vm48_vm2, %v337_v59 }
 0x16a   :  { %v224_v61 = vpop.f32.mrb[0].mxu0 }
 0x16b   :  { %v225_v62 = vpop.f32.mrb[1].mxu0 }
 0x16c   :  { %v226_v63 = vadd.f32 %v225_v62, %v224_v61 }
 0x16e   :  { %165 = vst [vmem:[#allocation5] sm:$0xff] %v226_v63  ;;  %v227_v0 = vpop.f32.mrb[0].mxu1 }
 0x16f   :  { %v228_v1 = vpop.f32.mrb[1].mxu1 }
 0x170   :  { %v229_v2 = vadd.f32 %v228_v1, %v227_v0 }
 0x172   :  { %166 = vst [vmem:[#allocation5 + $0x8] sm:$0xff] %v229_v2 }
 0x173   :  { %318 = shalt.err (!%p315_p12)
}
 0x174   :  { %s319_s7 = scalar_lea.hbm %s401_s3, 256 }
 0x175   :  { %p320_p13 = scmp.ne.s32.totalorder %s401_s3, %s319_s7  ;;  %p323_p0 = scmp.lt.u32.totalorder %s319_s7, %s401_s3 }
 0x177   :  { %p325_p1 = pnand %p323_p0, %p320_p13 }
 0x179   :  { %328 = shalt.err (!%p325_p1)
}
 0x17a   :  { %178 = dma.vmem_to_hbm [thread:$0]  %s173_s4, 256, %s401_s3, [#allocation4], %s334_s22, %s334_s22, %s335_s23  }
 0x17b   :  { %331 = dma.done.wait [#allocation4], 256  }
 0x17c   :  { %332 = vsyncadd [#allocation4], 4294967040 }
 0x17d   :  { %182 = vsyncpa [#allocation3], 1 }
 0x17e   :  { %183 = vsyncpa [#allocation4], 1 }

</bundles_post_ra>
